<compile_context>
chip_gen: v6e
topology: v6e:2x2x1
jax: 0.10.0
libtpu: 0.0.40
codegen_flags: <defaults>
</compile_context>

<pallas_src>
import numpy as np
import jax
import jax.numpy as jnp
from jax.experimental import pallas as pl
from jax.experimental.pallas import tpu as pltpu


def _round_up(v, m):
    return (v + m - 1) // m * m


def _cdiv(a, b):
    return -(-a // b)


def _hann_periodic(m: int) -> np.ndarray:
    # == scipy.signal.get_window("hann", m, fftbins=True)
    return 0.5 - 0.5 * np.cos(2.0 * np.pi * np.arange(m) / m)


def window_sumsquare_np(n_frames, hop_length, win_length, n_fft, dtype=np.float32):
    """Verbatim port of the module-level window_sumsquare (hann, norm=None)."""
    n = n_fft + hop_length * (n_frames - 1)
    x = np.zeros(n, dtype=dtype)
    win_sq = _hann_periodic(win_length) ** 2          # normalize(norm=None) is identity
    # pad_center(win_sq, n_fft) is a no-op here because win_length == n_fft
    for i in range(n_frames):
        sample = i * hop_length
        x[sample:min(n, sample + n_fft)] += win_sq[:max(0, min(n_fft, n - sample))]
    return x


# ------------------------ generation-aware compiler params -------------------------

def _vmem_limit_bytes():
    try:
        info = pltpu.get_tpu_info()
        cap = int(getattr(info, "vmem_capacity_bytes", 64 * 1024 * 1024))
    except Exception:
        cap = 64 * 1024 * 1024          # conservative fallback: v7x per-core VMEM
    # ~80% of physical VMEM: headroom for compiler scratch on v7x (64 MiB physical),
    # while unlocking more than the 32 MiB default on v5e/v6e (128 MiB physical).
    return min(int(cap * 0.8), 100 * 1024 * 1024)


_VMEM_LIMIT = _vmem_limit_bytes()

_MOSAIC_PARAMS = pltpu.CompilerParams(
    dimension_semantics=("parallel",),        # shard row tiles across both TCs on v7x
    vmem_limit_bytes=_VMEM_LIMIT,
)


# ----------------------------- Pallas kernels ------------------------------

def _fwd_mag_ri_kernel(frames_ref, basis_ref, mag_ref, ri_ref):
    """Forward projection + magnitude (standalone transform() API). bf16 outputs."""
    ri = jnp.dot(frames_ref[...], basis_ref[...], preferred_element_type=jnp.float32)
    cp = ri.shape[-1] // 2                            # lane-aligned (multiple of 128)
    re = ri[:, :cp]
    im = ri[:, cp:]
    mag_ref[...] = jnp.sqrt(re * re + im * im).astype(mag_ref.dtype)
    ri_ref[...] = ri.astype(ri_ref.dtype)


def _fwd_inv_kernel(frames_ref, fwd_ref, inv_ref, out_ref):
    """Fused forward+inverse round trip: (frames @ fwd) @ inv, ri never leaves VMEM."""
    ri = jnp.dot(frames_ref[...], fwd_ref[...], preferred_element_type=jnp.float32)
    out = jnp.dot(ri.astype(jnp.bfloat16), inv_ref[...],
                  preferred_element_type=jnp.float32)
    out_ref[...] = out.astype(out_ref.dtype)


def _magphase_inv_kernel(mag_ref, ph_ref, ibasis_ref, out_ref):
    """Fused inverse: re/im = mag*cos/sin(phase) in-kernel (EUP), then one MXU matmul."""
    mag = mag_ref[...].astype(jnp.float32)
    ph = ph_ref[...].astype(jnp.float32)
    re = mag * jnp.cos(ph)
    im = mag * jnp.sin(ph)
    ri = jnp.concatenate([re, im], axis=-1).astype(jnp.bfloat16)
    out = jnp.dot(ri, ibasis_ref[...], preferred_element_type=jnp.float32)
    out_ref[...] = out.astype(out_ref.dtype)


def _inv_ri_kernel(ri_ref, ibasis_ref, out_ref):
    """Plain inverse projection: [re | im] @ [inv_r ; inv_i] (fallback path)."""
    ri = ri_ref[...].astype(jnp.bfloat16)
    out = jnp.dot(ri, ibasis_ref[...], preferred_element_type=jnp.float32)
    out_ref[...] = out.astype(out_ref.dtype)


# ----------------------------- grid / spec helpers ------------------------------

def _pick_row_tile(m, max_tile=1024, align=256):
    """Row tile: MXU-aligned (256), up to 1024 rows, even tile count when split."""
    if m <= align:
        return _round_up(m, 16)                 # tiny problems: don't inflate padding
    n_tiles = _cdiv(m, max_tile)
    if n_tiles > 1 and n_tiles % 2 == 1:
        n_tiles += 1                            # even count -> both v7x TCs stay busy
    tile = _round_up(_cdiv(m, n_tiles), align)
    return min(tile, max_tile)


def _row_grid(m):
    tile_m = _pick_row_tile(m)
    m_pad = _round_up(m, tile_m)
    return tile_m, m_pad, (m_pad // tile_m,)


def _pad_rows(x, m_pad):
    m = x.shape[0]
    if m_pad == m:
        return x
    return jnp.pad(x, ((0, m_pad - m), (0, 0)))


def _probe_buffered_kernel(a_ref, b_ref, o_ref):
    o_ref[...] = a_ref[...] + b_ref[...]


def _buffered_one_supported():
    """Probe once whether pipeline_mode=pl.Buffered(1) is accepted by this backend."""
    try:
        a = jnp.zeros((16, 128), jnp.float32)
        b = jnp.zeros((8, 128), jnp.float32)
        out = pl.pallas_call(
            _probe_buffered_kernel,
            out_shape=jax.ShapeDtypeStruct((16, 128), jnp.float32),
            grid=(2,),
            in_specs=[pl.BlockSpec((8, 128), lambda i: (i, 0)),
                      pl.BlockSpec((8, 128), lambda i: (0, 0),
                                   pipeline_mode=pl.Buffered(1))],
            out_specs=pl.BlockSpec((8, 128), lambda i: (i, 0)),
        )(a, b)
        jax.block_until_ready(out)
        return True
    except Exception:
        return False


_BUFFERED_ONE = _buffered_one_supported()


def _resident_spec(shape):
    """Constant-index operand: stays VMEM-resident; single-buffer it when supported."""
    if _BUFFERED_ONE:
        return pl.BlockSpec(shape, lambda i: (0, 0), pipeline_mode=pl.Buffered(1))
    return pl.BlockSpec(shape, lambda i: (0, 0))


# ----------------------------- Pallas wrappers ------------------------------

def transform_pallas(frames, fwd_basis):
    """frames: (M, N) bf16; fwd_basis: (N, 2*Cpad) bf16 -> (mag bf16, ri bf16)."""
    m, n = frames.shape
    two_cp = fwd_basis.shape[1]
    cp = two_cp // 2
    tile_m, m_pad, grid = _row_grid(m)
    frames = _pad_rows(frames, m_pad)
    mag, ri = pl.pallas_call(
        _fwd_mag_ri_kernel,
        out_shape=(jax.ShapeDtypeStruct((m_pad, cp), jnp.bfloat16),
                   jax.ShapeDtypeStruct((m_pad, two_cp), jnp.bfloat16)),
        grid=grid,
        in_specs=[pl.BlockSpec((tile_m, n), lambda i: (i, 0)),      # streamed row tiles
                  _resident_spec((n, two_cp))],                     # VMEM-resident basis
        out_specs=(pl.BlockSpec((tile_m, cp), lambda i: (i, 0)),
                   pl.BlockSpec((tile_m, two_cp), lambda i: (i, 0))),
        compiler_params=_MOSAIC_PARAMS,
    )(frames, fwd_basis)
    return mag[:m], ri[:m]


def forward_inverse_pallas(frames, fwd_basis, inv_basis):
    """Fused forward()+inverse() round trip: frames (M,N) bf16 -> frames_out (M,N) bf16."""
    m, n = frames.shape
    two_cp = fwd_basis.shape[1]
    tile_m, m_pad, grid = _row_grid(m)
    frames = _pad_rows(frames, m_pad)
    out = pl.pallas_call(
        _fwd_inv_kernel,
        out_shape=jax.ShapeDtypeStruct((m_pad, n), jnp.bfloat16),
        grid=grid,
        in_specs=[pl.BlockSpec((tile_m, n), lambda i: (i, 0)),
                  _resident_spec((n, two_cp)),
                  _resident_spec((two_cp, n))],
        out_specs=pl.BlockSpec((tile_m, n), lambda i: (i, 0)),
        compiler_params=_MOSAIC_PARAMS,
    )(frames, fwd_basis, inv_basis)
    return out[:m]


def inverse_ri_pallas(ri, inv_basis):
    """ri: (M, 2*Cpad); inv_basis: (2*Cpad, N) bf16 -> frames_out (M, N) bf16."""
    m, two_cp = ri.shape
    n = inv_basis.shape[1]
    tile_m, m_pad, grid = _row_grid(m)
    ri = _pad_rows(ri, m_pad)
    out = pl.pallas_call(
        _inv_ri_kernel,
        out_shape=jax.ShapeDtypeStruct((m_pad, n), jnp.bfloat16),
        grid=grid,
        in_specs=[pl.BlockSpec((tile_m, two_cp), lambda i: (i, 0)),
                  _resident_spec((two_cp, n))],
        out_specs=pl.BlockSpec((tile_m, n), lambda i: (i, 0)),
        compiler_params=_MOSAIC_PARAMS,
    )(ri, inv_basis)
    return out[:m]


_TRIG_IN_KERNEL_OK = None


def inverse_magphase_pallas(mag, ph, inv_basis):
    """mag/ph: (M, Cpad); inv_basis: (2*Cpad, N) bf16 -> frames_out (M, N) bf16.

    Trig is fused into the kernel (EUP, hidden under the MXU matmul); falls back to
    XLA trig + the plain ri-matmul kernel if sin/cos lowering is unsupported.
    """
    global _TRIG_IN_KERNEL_OK
    m, cp = mag.shape
    two_cp, n = inv_basis.shape
    tile_m, m_pad, grid = _row_grid(m)
    mag_p = _pad_rows(mag, m_pad)
    ph_p = _pad_rows(ph, m_pad)
    if _TRIG_IN_KERNEL_OK is not False:
        try:
            out = pl.pallas_call(
                _magphase_inv_kernel,
                out_shape=jax.ShapeDtypeStruct((m_pad, n), jnp.bfloat16),
                grid=grid,
                in_specs=[pl.BlockSpec((tile_m, cp), lambda i: (i, 0)),
                          pl.BlockSpec((tile_m, cp), lambda i: (i, 0)),
                          _resident_spec((two_cp, n))],
                out_specs=pl.BlockSpec((tile_m, n), lambda i: (i, 0)),
                compiler_params=_MOSAIC_PARAMS,
            )(mag_p, ph_p, inv_basis)
            _TRIG_IN_KERNEL_OK = True
            return out[:m]
        except Exception:
            _TRIG_IN_KERNEL_OK = False
    # Fallback: trig in XLA glue, matmul still in Pallas.
    re = (mag * jnp.cos(ph)).astype(jnp.bfloat16)
    im = (mag * jnp.sin(ph)).astype(jnp.bfloat16)
    ri = jnp.concatenate([re, im], axis=1)
    return inverse_ri_pallas(ri, inv_basis)


# ------------------------------- STFT module --------------------------------

class STFT:
    def __init__(self, filter_length, hop_length, win_length, window="hann"):
        assert window == "hann"
        assert filter_length >= win_length
        self.filter_length = filter_length
        self.hop_length = hop_length
        self.win_length = win_length
        self.window = window

        cutoff = filter_length // 2 + 1
        self.cutoff = cutoff
        # Lane-pad the frequency axis to a multiple of 128 (513->640, 129->256).
        self.cpad = _round_up(cutoff, 128)

        scale = filter_length / hop_length
        fourier_basis = np.fft.fft(np.eye(filter_length))
        fourier_basis = np.vstack([np.real(fourier_basis[:cutoff, :]),
                                   np.imag(fourier_basis[:cutoff, :])])           # (2C, N)
        forward_basis = fourier_basis.copy()
        inverse_basis = np.linalg.pinv(scale * fourier_basis).T                   # (2C, N)

        fft_window = _hann_periodic(win_length)
        # pad_center(fft_window, filter_length): no-op (win_length == filter_length)
        forward_basis = forward_basis * fft_window[None, :]
        inverse_basis = inverse_basis * fft_window[None, :]

        # Forward basis for (frames @ basis): (N, 2*Cpad), zero-padded lanes.
        fwd = np.zeros((filter_length, 2 * self.cpad), np.float32)
        fwd[:, :cutoff] = forward_basis[:cutoff].T
        fwd[:, self.cpad:self.cpad + cutoff] = forward_basis[cutoff:].T
        # Inverse basis for ([re | im] @ basis): (2*Cpad, N), zero-padded rows.
        inv = np.zeros((2 * self.cpad, filter_length), np.float32)
        inv[:cutoff] = inverse_basis[:cutoff]
        inv[self.cpad:self.cpad + cutoff] = inverse_basis[cutoff:]

        # bf16 bases (f32 accumulation happens in-kernel).
        self.fwd_basis = jnp.asarray(fwd, dtype=jnp.bfloat16)
        self.inv_basis = jnp.asarray(inv, dtype=jnp.bfloat16)

    # -- framing (gather free: K shifted contiguous slices) -------------------
    def _frames(self, x):
        b, _ = x.shape
        n, hop = self.filter_length, self.hop_length
        half = n // 2
        padded = jnp.pad(x, ((0, 0), (half, half)), mode="reflect")
        plen = padded.shape[1]
        t = (plen - n) // hop + 1
        k = _cdiv(n, hop)                      # each frame = k hop-sized chunks
        rows = t + k - 1
        total = rows * hop
        if total > plen:
            padded = jnp.pad(padded, ((0, 0), (0, total - plen)))
        strips = padded[:, :total].reshape(b, rows, hop)
        r = n - (k - 1) * hop                  # width of the final (possibly partial) chunk
        # TODO(synk): fully in-kernel framing (memory_space=pl.ANY + manual double-buffered
        # make_async_copy per frame) would avoid materializing the ~N/hop-expanded frames
        # array in HBM entirely (biggest remaining traffic term on v6e).
        chunks = [strips[:, i:i + t, :] for i in range(k - 1)]
        chunks.append(strips[:, k - 1:k - 1 + t, :r])
        frames = jnp.concatenate(chunks, axis=2)             # (B, T, N)
        return frames.reshape(b * t, n).astype(jnp.bfloat16), b, t

    # -- overlap-add + window correction (scatter free) -----------------------
    def _reconstruct_from_frames(self, frames_out, b, t):
        n, hop = self.filter_length, self.hop_length
        frames_out = frames_out.reshape(b, t, n)
        k = _cdiv(n, hop)
        rows = t + k - 1
        r = n - (k - 1) * hop
        acc = jnp.zeros((b, rows, hop), jnp.float32)          # f32 accumulation
        for i in range(k):
            w = hop if i < k - 1 else r
            chunk = frames_out[:, :, i * hop:i * hop + w].astype(jnp.float32)
            acc = acc + jnp.pad(chunk, ((0, 0), (i, rows - t - i), (0, hop - w)))
        out_len = n + hop * (t - 1)
        inv_t = acc.reshape(b, rows * hop)[:, :out_len]

        window_sum = window_sumsquare_np(t, hop, self.win_length, n)
        tiny = np.finfo(window_sum.dtype).tiny
        corr = np.where(window_sum > tiny, 1.0 / window_sum, 1.0).astype(np.float32)
        corr *= float(n) / hop
        inv_t = inv_t * jnp.asarray(corr)[None, :]
        inv_t = inv_t[:, n // 2: out_len - n // 2]
        return inv_t[:, None, :]                              # (B, 1, L) like PyTorch

    # -- public API (PyTorch layouts) ------------------------------------------
    def transform(self, x, use_pallas=True):
        frames, b, t = self._frames(x)
        c, cp = self.cutoff, self.cpad
        if use_pallas:
            mag_p, ri = transform_pallas(frames, self.fwd_basis)
        else:
            ri_f32 = jnp.dot(frames, self.fwd_basis, preferred_element_type=jnp.float32)
            mag_p = jnp.sqrt(ri_f32[:, :cp] ** 2 + ri_f32[:, cp:] ** 2).astype(jnp.bfloat16)
            ri = ri_f32.astype(jnp.bfloat16)
        re = ri[:, :c]
        im = ri[:, cp:cp + c]
        phase = jnp.arctan2(im, re)
        mag = mag_p[:, :c]
        mag = mag.reshape(b, t, c).transpose(0, 2, 1).astype(jnp.float32)     # (B, C, T)
        phase = phase.reshape(b, t, c).transpose(0, 2, 1).astype(jnp.float32)  # (B, C, T)
        return mag, phase

    def inverse(self, magnitude, phase, use_pallas=True):
        b, c, t = magnitude.shape
        cp = self.cpad
        mag = magnitude.transpose(0, 2, 1).reshape(b * t, c)
        ph = phase.transpose(0, 2, 1).reshape(b * t, c)
        pad_cfg = ((0, 0), (0, cp - c))
        mag_p = jnp.pad(mag, pad_cfg)                      # lane-pad once; trig runs in-kernel
        ph_p = jnp.pad(ph, pad_cfg)
        if use_pallas:
            frames_out = inverse_magphase_pallas(mag_p, ph_p, self.inv_basis)
        else:
            re = (mag_p * jnp.cos(ph_p)).astype(jnp.bfloat16)
            im = (mag_p * jnp.sin(ph_p)).astype(jnp.bfloat16)
            ri = jnp.concatenate([re, im], axis=1)
            frames_out = jnp.dot(ri, self.inv_basis,
                                 preferred_element_type=jnp.float32).astype(jnp.bfloat16)
        return self._reconstruct_from_frames(frames_out, b, t)

    def forward(self, x, use_pallas=True):
        # Fused frame-major round trip: mag*cos(phase) == real, mag*sin(phase) == imag
        # exactly, so forward and inverse projections fuse into ONE kernel — ri never
        # leaves VMEM, no arctan2/cos/sin and no (B,C,T) transposes in the hot path.
        frames, b, t = self._frames(x)
        if use_pallas:
            frames_out = forward_inverse_pallas(frames, self.fwd_basis, self.inv_basis)
        else:
            ri = jnp.dot(frames, self.fwd_basis,
                         preferred_element_type=jnp.float32).astype(jnp.bfloat16)
            frames_out = jnp.dot(ri, self.inv_basis,
                                 preferred_element_type=jnp.float32).astype(jnp.bfloat16)
        return self._reconstruct_from_frames(frames_out, b, t)


if __name__ == "__main__":
    # Small shapes with the same structure as the original 1024 / 160 / 1024 config.
    FILTER_LENGTH, HOP_LENGTH, WIN_LENGTH = 256, 64, 256
    B, NUM_SAMPLES = 2, 1024

    key = jax.random.PRNGKey(0)
    x = jax.random.normal(key, (B, NUM_SAMPLES), dtype=jnp.float32)

    stft = STFT(FILTER_LENGTH, HOP_LENGTH, WIN_LENGTH, window="hann")

    # transform(): Pallas kernel vs pure-JAX reference of the same bf16 pipeline.
    mag_p, ph_p = stft.transform(x, use_pallas=True)
    mag_r, _ = stft.transform(x, use_pallas=False)
    jax.block_until_ready((mag_p, ph_p))
    np.testing.assert_allclose(np.asarray(mag_p), np.asarray(mag_r), rtol=1e-2, atol=1e-2)

    # forward(): fused round-trip kernel, Pallas vs reference, and vs the input signal.
    recon = jax.block_until_ready(stft.forward(x, use_pallas=True))
    recon_ref = jax.block_until_ready(stft.forward(x, use_pallas=False))
    assert recon.shape == (B, 1, (NUM_SAMPLES // HOP_LENGTH) * HOP_LENGTH), recon.shape
    np.testing.assert_allclose(np.asarray(recon), np.asarray(recon_ref), rtol=1e-2, atol=1e-2)
    np.testing.assert_allclose(np.asarray(recon[:, 0, :]), np.asarray(x), rtol=0, atol=1e-1)

    # Exercise the standalone inverse() API path (mag/phase -> audio) as well.
    recon2 = jax.block_until_ready(stft.inverse(mag_p, ph_p, use_pallas=True))
    np.testing.assert_allclose(np.asarray(recon2[:, 0, :]), np.asarray(x), rtol=0, atol=1e-1)

    print("KERNEL_OK")
</pallas_src>

<mosaic_0001>
module attributes {stable_mosaic.version = 11 : i64} {
  func.func @_probe_buffered_kernel(%arg0: i32, %arg1: memref<8x128xf32, #tpu.memory_space<vmem>>, %arg2: memref<8x128xf32, #tpu.memory_space<vmem>>, %arg3: memref<8x128xf32, #tpu.memory_space<vmem>>) attributes {dimension_semantics = [#tpu.dimension_semantics<arbitrary>], iteration_bounds = array<i64: 2>, scalar_prefetch = 0 : i64, scratch_operands = 0 : i64, tpu.core_type = #tpu.core_type<tc>, window_params = [{transform_indices = @transform_0, window_bounds = array<i64: 8, 128>}, {pipeline_mode = #tpu.pipeline_mode<synchronous>, transform_indices = @transform_1, window_bounds = array<i64: 8, 128>}, {transform_indices = @transform_2, window_bounds = array<i64: 8, 128>}]} {
    %c0 = arith.constant 0 : index
    %c0_0 = arith.constant 0 : index
    %0 = vector.load %arg1[%c0, %c0_0] : memref<8x128xf32, #tpu.memory_space<vmem>>, vector<8x128xf32>
    %c0_1 = arith.constant 0 : index
    %c0_2 = arith.constant 0 : index
    %1 = vector.load %arg2[%c0_1, %c0_2] : memref<8x128xf32, #tpu.memory_space<vmem>>, vector<8x128xf32>
    %2 = arith.addf %0, %1 : vector<8x128xf32>
    %c0_3 = arith.constant 0 : index
    %c0_4 = arith.constant 0 : index
    %3 = vector.load %arg3[%c0_3, %c0_4] : memref<8x128xf32, #tpu.memory_space<vmem>>, vector<8x128xf32>
    tpu.vector_store %arg3[%c0_3, %c0_4], %2 {strides = array<i32>} : memref<8x128xf32, #tpu.memory_space<vmem>>, vector<8x128xf32>,
    return
  }
  func.func @transform_0(%arg0: i32) -> (i32, i32) {
    %c0_i32 = arith.constant 0 : i32
    %c0_i32_0 = arith.constant 0 : i32
    return %arg0, %c0_i32 : i32, i32
  }
  func.func @transform_1(%arg0: i32) -> (i32, i32) {
    %c0_i32 = arith.constant 0 : i32
    %c0_i32_0 = arith.constant 0 : i32
    %c0_i32_1 = arith.constant 0 : i32
    return %c0_i32, %c0_i32_0 : i32, i32
  }
  func.func @transform_2(%arg0: i32) -> (i32, i32) {
    %c0_i32 = arith.constant 0 : i32
    %c0_i32_0 = arith.constant 0 : i32
    return %arg0, %c0_i32 : i32, i32
  }
}

module attributes {stable_mosaic.version = 11 : i64} {
  func.func @_fwd_mag_ri_kernel(%arg0: i32, %arg1: memref<48x256xbf16, #tpu.memory_space<vmem>>, %arg2: memref<256x512xbf16, #tpu.memory_space<vmem>>, %arg3: memref<48x256xbf16, #tpu.memory_space<vmem>>, %arg4: memref<48x512xbf16, #tpu.memory_space<vmem>>) attributes {dimension_semantics = [#tpu.dimension_semantics<parallel>], iteration_bounds = array<i64: 1>, scalar_prefetch = 0 : i64, scratch_operands = 0 : i64, tpu.core_type = #tpu.core_type<tc>, window_params = [{transform_indices = @transform_0, window_bounds = array<i64: 48, 256>}, {pipeline_mode = #tpu.pipeline_mode<synchronous>, transform_indices = @transform_1, window_bounds = array<i64: 256, 512>}, {transform_indices = @transform_2, window_bounds = array<i64: 48, 256>}, {transform_indices = @transform_3, window_bounds = array<i64: 48, 512>}]} {
    %c0 = arith.constant 0 : index
    %c0_0 = arith.constant 0 : index
    %0 = vector.load %arg1[%c0, %c0_0] : memref<48x256xbf16, #tpu.memory_space<vmem>>, vector<48x256xbf16>
    %c0_1 = arith.constant 0 : index
    %c0_2 = arith.constant 0 : index
    %1 = vector.load %arg2[%c0_1, %c0_2] : memref<256x512xbf16, #tpu.memory_space<vmem>>, vector<256x512xbf16>
    %cst = arith.constant dense<0.000000e+00> : vector<48x512xf32>
    %2 = tpu.matmul %0, %1, %cst {dimension_numbers = #tpu.dot_dimension_numbers<[1], [0], [0], [1], [0, 0, 1, 1], [], []>} : vector<48x256xbf16>, vector<256x512xbf16>, vector<48x512xf32> -> vector<48x512xf32>
    %3 = vector.extract_strided_slice %2 {offsets = [0, 0], sizes = [48, 256], strides = [1, 1]} : vector<48x512xf32> to vector<48x256xf32>
    %4 = vector.extract_strided_slice %2 {offsets = [0, 256], sizes = [48, 256], strides = [1, 1]} : vector<48x512xf32> to vector<48x256xf32>
    %5 = arith.mulf %3, %3 : vector<48x256xf32>
    %6 = arith.mulf %4, %4 : vector<48x256xf32>
    %7 = arith.addf %5, %6 : vector<48x256xf32>
    %8 = math.sqrt %7 : vector<48x256xf32>
    %9 = arith.truncf %8 : vector<48x256xf32> to vector<48x256xbf16>
    %c0_3 = arith.constant 0 : index
    %c0_4 = arith.constant 0 : index
    %10 = vector.load %arg3[%c0_3, %c0_4] : memref<48x256xbf16, #tpu.memory_space<vmem>>, vector<48x256xbf16>
    tpu.vector_store %arg3[%c0_3, %c0_4], %9 {strides = array<i32>} : memref<48x256xbf16, #tpu.memory_space<vmem>>, vector<48x256xbf16>,
    %11 = arith.truncf %2 : vector<48x512xf32> to vector<48x512xbf16>
    %c0_5 = arith.constant 0 : index
    %c0_6 = arith.constant 0 : index
    %12 = vector.load %arg4[%c0_5, %c0_6] : memref<48x512xbf16, #tpu.memory_space<vmem>>, vector<48x512xbf16>
    tpu.vector_store %arg4[%c0_5, %c0_6], %11 {strides = array<i32>} : memref<48x512xbf16, #tpu.memory_space<vmem>>, vector<48x512xbf16>,
    return
  }
  func.func @transform_0(%arg0: i32) -> (i32, i32) {
    %c0_i32 = arith.constant 0 : i32
    %c0_i32_0 = arith.constant 0 : i32
    return %arg0, %c0_i32 : i32, i32
  }
  func.func @transform_1(%arg0: i32) -> (i32, i32) {
    %c0_i32 = arith.constant 0 : i32
    %c0_i32_0 = arith.constant 0 : i32
    %c0_i32_1 = arith.constant 0 : i32
    return %c0_i32, %c0_i32_0 : i32, i32
  }
  func.func @transform_2(%arg0: i32) -> (i32, i32) {
    %c0_i32 = arith.constant 0 : i32
    %c0_i32_0 = arith.constant 0 : i32
    return %arg0, %c0_i32 : i32, i32
  }
  func.func @transform_3(%arg0: i32) -> (i32, i32) {
    %c0_i32 = arith.constant 0 : i32
    %c0_i32_0 = arith.constant 0 : i32
    return %arg0, %c0_i32 : i32, i32
  }
}

</mosaic_0001>

<bundles_post_ra>
// kernel: tpu_custom_call.1
= control target key start
LH: loop header
LB: loop body
LE: loop exit
PB: predicated region body
PF: predicated region fallthrough
CT: control target
= control target key end

     0   :  { %7 = vsyncpa [#allocation3], 0  ;;  %s649_s0 = inlined_call_operand.hbm [shape: f32[16,128], index: 0, kind: input, shape index: {}]   ;;  %s650_s1 = inlined_call_operand.hbm [shape: f32[8,128], index: 1, kind: input, shape index: {}]   ;;  %s651_s2 = inlined_call_operand.hbm [shape: f32[16,128], index: 2, kind: output, shape index: {}]  }
   0x1   :  { %9 = vsyncpa [#allocation3 + $0x1], 0 }
   0x2   :  { %10 = vsyncpa [#allocation6], 0 }
   0x3   :  { %11 = vsyncpa [#allocation4], 0 }
   0x4   :  { %13 = vsyncpa [#allocation4 + $0x1], 0  ;;  %s483_s9 = smov 0   ;;  %s485_s10 = smov 0  }
   0x5   :  { %s487_s11 = smov 0   ;;  %s489_s12 = smov 0  }
   0x6 LB: > { %s504_s13 = sadd.s32 4294967295, %s463_s12   ;;  %s270_s14 = sadd.s32 4294967294, %s463_s12   ;;  %s463_s12 = sphi %s489_s12, %s674_s12   ;;  %s459_s11 = sphi %s487_s11, %s673_s11   ;;  %s455_s10 = sphi %s485_s10, %s672_s10   ;;  %s451_s9 = sphi %s483_s9, %s671_s9  }
   0x7   : > { %p39_p0 = scmp.ne.s32.totalorder %s455_s10, %s451_s9  ;;  %p652_p1 = scmp.eq.s32.totalorder %s504_s13, 0 }
   0x8   : > { %p90_p3 = scmp.eq.s32.totalorder %s270_s14, 1  ;;  %p271_p5 = scmp.ge.s32.totalorder %s463_s12, 1 }
   0x9   : > { %p513_p4 = por %p652_p1, %p39_p0  ;;  %p97_p7 = scmp.lt.s32.totalorder %s463_s12, 3 }
   0xa   : > { %p518_p6 = por %p90_p3, %p39_p0  ;;  %s465_s18 = smov [#allocation5]  }
   0xb   : > { %s656_s15 = scalar_select %p513_p4, 1, 0 }
   0xc   : > { %s657_s16 = scalar_select %p518_p6, 1, 0 }
   0xd   : > { %p523_p8 = pnand %p271_p5, %p97_p7  ;;  %s110_s19 = sshll.u32 %s465_s18, 4  ;;  %s111_s19 = int_to_ptr.vmem [resolvable:$true] %s110_s19 }
   0xe   : > { %s531_s20 = sadd.s32 1, %s463_s12   ;;  %s26_s24 = sadd.s32 1, %s459_s11 }
   0xf   : > { %s658_s17 = scalar_select %p523_p8, 1, 0 }
  0x10   : > { %p292_p10 = pneg %p523_p8  ;;  %s23_s22 = ssub.s32 %s463_s12, %s531_s20 }
  0x11   : > { %p541_p12 = scmp.eq.s32.totalorder %s23_s22, 0  ;;  %p33_p13 = scmp.ne.s32.totalorder %s459_s11, %s455_s10 }
  0x12   : > { %p535_p11 = pnand %p292_p10, %p652_p1  ;;  %s352_s25 = scalar_lea.vmem %s111_s19, 128 }
  0x13   : > { %p353_p3 = scmp.ne.s32.totalorder %s111_s19, %s352_s25  ;;  %p360_p9 = scmp.lt.s32.totalorder %s111_s19, %s111_s19 }
  0x14   : > { %p343_p0 = pneg %p535_p11  ;;  %p361_p2 = scmp.lt.s32.totalorder %s352_s25, %s352_s25 }
  0x16   : > { %p355_p5 = pnand %p353_p3, %p343_p0  ;;  %p362_p10 = por %p361_p2, %p360_p9 }
  0x18   : > { %p356_p7 = pneg %p355_p5 }
  0x1a   : > { %p363_p1 = pnand %p362_p10, %p356_p7 }
  0x1c   : > { %366 = shalt.err (!%p363_p1)
}
  0x1d   : > { %295 = dma.hbm_to_vmem [thread:$0]  (!%p535_p11), %s650_s1, 128, %s111_s19, [#allocation6]  }
  0x1e   : > { %s558_s28 = scalar_select %p541_p12, %s459_s11, %s26_s24  }
  0x1f   : > { %p34_p1 = scmp.eq.s32.totalorder %s463_s12, 0  ;;  %p661_p2 = scmp.eq.s32.totalorder %s504_s13, 1 }
  0x20   : > { %p305_p0 = scmp.lt.s32.totalorder %s463_s12, 2  ;;  %s121_s30 = sand.u32 1, %s459_s11  }
  0x21   : > { %p566_p9 = por %p661_p2, %p33_p13  ;;  %p35_p3 = por %p34_p1, %p33_p13 }
  0x22   : > { %s274_s3 = sshll.u32 %s121_s30, 3  ;;  %s275_s4 = sshll.u32 %s463_s12, 7 }
  0x23   : > { %s662_s29 = scalar_select %p566_p9, 1, 0 }
  0x24   : > { %s579_s7 = scalar_lea.hbm %s649_s0, %s275_s4  ;;  %s125_s8 = scalar_lea.vmem [#allocation2], %s274_s3 }
  0x25   : > { %s132_s14 = sshll.u32 %s125_s8, 4  ;;  %p581_p11 = pnand %p305_p0, %p35_p3  ;;  %s133_s14 = int_to_ptr.vmem [resolvable:$true] %s132_s14 }
  0x26   : > { %s122_s19 = scalar_lea.sflag [#allocation3], %s121_s30  ;;  %s367_s21 = scalar_lea.hbm %s579_s7, 128 }
  0x27   : > { %p368_p12 = scmp.ne.s32.totalorder %s579_s7, %s367_s21  ;;  %p369_p13 = pneg %p581_p11 }
  0x28   : > { %s372_s24 = scalar_lea.hbm %s649_s0, 256  ;;  %p373_p10 = scmp.lt.s32.totalorder %s579_s7, %s649_s0 }
  0x29   : > { %p370_p5 = pnand %p369_p13, %p368_p12  ;;  %p374_p1 = scmp.lt.s32.totalorder %s372_s24, %s367_s21 }
  0x2b   : > { %p371_p7 = pneg %p370_p5  ;;  %p375_p2 = por %p374_p1, %p373_p10 }
  0x2d   : > { %p376_p0 = pnand %p375_p2, %p371_p7 }
  0x2f   : > { %379 = shalt.err (!%p376_p0)
}
  0x30   : > { %s380_s27 = scalar_lea.vmem %s133_s14, 128  ;;  %s466_s30 = smov [#allocation2]  }
  0x31   : > { %p381_p3 = scmp.ne.s32.totalorder %s133_s14, %s380_s27  ;;  %s385_s3 = sshll.u32 %s466_s30, 4  ;;  %s386_s3 = int_to_ptr.vmem [resolvable:$false] %s385_s3 }
  0x32   : > { %s387_s4 = scalar_lea.vmem %s386_s3, 256  ;;  %p388_p12 = scmp.lt.s32.totalorder %s133_s14, %s386_s3 }
  0x33   : > { %p383_p6 = pnand %p381_p3, %p369_p13  ;;  %p389_p5 = scmp.lt.s32.totalorder %s387_s4, %s380_s27 }
  0x35   : > { %p384_p9 = pneg %p383_p6  ;;  %p390_p4 = por %p389_p5, %p388_p12 }
  0x37   : > { %p391_p8 = pnand %p390_p4, %p384_p9 }
  0x39   : > { %394 = shalt.err (!%p391_p8)
}
  0x3a   : > { %299 = dma.hbm_to_vmem [thread:$0]  (!%p581_p11), %s579_s7, 128, %s133_s14, %s122_s19  }
  0x3b   : > { %p664_p7 = scmp.ne.s32.totalorder %s658_s17, 0 }
  0x3c   : > { %s602_s5 = sand.u32 (!%p664_p7), 1, %s455_s10   ;;  %p665_p6 = scmp.ne.s32.totalorder (!%p664_p7), %s656_s15, 0 }
  0x3d   : > { %141 = sbr.rel (%p664_p7) target bundleno = 95 (0x5f), region = 28  ;;  %s277_s6 = sshll.u32 (!%p664_p7), %s602_s5, 3 }
  0x3e   : > { %s144_s8 = scalar_lea.sflag (!%p664_p7), [#allocation3], %s602_s5  ;;  %s147_s21 = scalar_lea.vmem (!%p664_p7), [#allocation2], %s277_s6 }
  0x42   : > { %438 = dma.done.wait (%p665_p6), %s144_s8, 128  }
  0x43   : > { %440 = vsyncadd (%p665_p6), %s144_s8, 4294967168  ;;  %p666_p4 = scmp.eq.s32.totalorder %s504_s13, 0 }
  0x45   : > { %442 = dma.done.wait (%p666_p4), [#allocation6], 128   ;;  %p667_p8 = pmov %p666_p4 }
  0x46   : > { %s171_s17 = scalar_lea.vmem [#allocation7], %s277_s6  ;;  %s281_s14 = sshll.u32 %s504_s13, 7  ;;  %v172_v0 = vld [vmem:[%s147_s21] sm:$0xff]  ;;  %v173_v1 = vld [vmem:[#allocation5] sm:$0xff] }
  0x47   : > { %444 = vsyncadd (%p667_p8), [#allocation6], 4294967168  ;;  %s190_s7 = sshll.u32 %s171_s17, 4  ;;  %v174_v2 = vadd.f32 %v173_v1, %v172_v0  ;;  %s188_s15 = scalar_lea.hbm %s651_s2, %s281_s14  ;;  %s191_s7 = int_to_ptr.vmem [resolvable:$true] %s190_s7 }
  0x48   : > { %s177_s22 = scalar_lea.sflag [#allocation4], %s602_s5  ;;  %s395_s23 = scalar_lea.vmem %s191_s7, 128 }
  0x49   : > { %175 = vst [vmem:[%s171_s17] sm:$0xff] %v174_v2  ;;  %p396_p9 = scmp.ne.s32.totalorder %s191_s7, %s395_s23  ;;  %p668_p11 = scmp.ne.s32.totalorder %s662_s29, 0 }
  0x4a   : > { %s467_s24 = smov [#allocation7]  }
  0x4b   : > { %p397_p13 = pnand %p396_p9, %p668_p11  ;;  %s399_s25 = sshll.u32 %s467_s24, 4  ;;  %s400_s25 = int_to_ptr.vmem [resolvable:$false] %s399_s25 }
  0x4c   : > { %s401_s26 = scalar_lea.vmem %s400_s25, 256  ;;  %p402_p1 = scmp.lt.s32.totalorder %s191_s7, %s400_s25 }
  0x4d   : > { %p398_p10 = pneg %p397_p13  ;;  %p403_p2 = scmp.lt.s32.totalorder %s401_s26, %s395_s23 }
  0x4f   : > { %p404_p0 = por %p403_p2, %p402_p1 }
  0x51   : > { %p405_p3 = pnand %p404_p0, %p398_p10 }
  0x53   : > { %408 = shalt.err (!%p405_p3)
}
  0x54   : > { %s409_s13 = scalar_lea.hbm %s188_s15, 128  ;;  %s413_s3 = scalar_lea.hbm %s651_s2, 256 }
  0x55   : > { %p410_p12 = scmp.ne.s32.totalorder %s188_s15, %s409_s13  ;;  %p414_p6 = scmp.lt.s32.totalorder %s188_s15, %s651_s2 }
  0x56   : > { %p415_p4 = scmp.lt.s32.totalorder %s413_s3, %s409_s13 }
  0x57   : > { %p411_p5 = pnand %p410_p12, %p668_p11 }
  0x58   : > { %p416_p8 = por %p415_p4, %p414_p6 }
  0x59   : > { %p412_p7 = pneg %p411_p5 }
  0x5b   : > { %p417_p9 = pnand %p416_p8, %p412_p7 }
  0x5d   : > { %420 = shalt.err (!%p417_p9)
}
  0x5e   : > { %290 = dma.vmem_to_hbm [thread:$0]  (%p668_p11), %s191_s7, 128, %s188_s15, %s177_s22  }
  0x5f PF: > { %s202_s6 = sand.u32 1, %s451_s9   ;;  %p669_p13 = scmp.ne.s32.totalorder %s657_s16, 0 }
  0x60   : > { %p670_p10 = scmp.ge.s32.totalorder %s463_s12, 2  ;;  %s203_s8 = scalar_lea.sflag [#allocation4], %s202_s6 }
  0x62   : > { %p301_p1 = pnand %p670_p10, %p669_p13 }
  0x64   : > { %p302_p2 = pneg %p301_p1 }
  0x66   : > { %446 = dma.done.wait (%p302_p2), %s203_s8, 128  }
  0x67   : > { %448 = vsyncadd (%p302_p2), %s203_s8, 4294967168  ;;  %p16_p0 = scmp.ge.s32.totalorder %s531_s20, 4   ;;  %s671_s9 = smov %s455_s10 }
  0x68   : > { %s672_s10 = smov %s459_s11  ;;  %s673_s11 = smov %s558_s28 }
  0x69   : > { %s674_s12 = smov %s531_s20  ;;  %18 = sbr.rel (!%p16_p0) target bundleno = 6 (0x6), region = 77 }
  0x6e   :  { %208 = vsyncpa [#allocation3], 1 }
  0x6f   :  { %210 = vsyncpa [#allocation3 + $0x1], 1 }
  0x70   :  { %211 = vsyncpa [#allocation6], 1 }
  0x71   :  { %212 = vsyncpa [#allocation4], 1 }
  0x72   :  { %214 = vsyncpa [#allocation4 + $0x1], 1 }

// kernel: tpu_custom_call.1
= control target key start
LH: loop header
LB: loop body
LE: loop exit
PB: predicated region body
PF: predicated region fallthrough
CT: control target
= control target key end

     0   :  { %9 = vsyncpa [#allocation3], 0  ;;  %s1368_s0 = inlined_call_operand.hbm [shape: bf16[48,256], index: 0, kind: input, shape index: {}]   ;;  %s1369_s1 = inlined_call_operand.hbm [shape: bf16[256,512], index: 1, kind: input, shape index: {}]   ;;  %s1370_s2 = inlined_call_operand.hbm [shape: bf16[48,256], index: 2, kind: output, shape index: {0}]   ;;  %s1371_s3 = inlined_call_operand.hbm [shape: bf16[48,512], index: 3, kind: output, shape index: {1}]  }
   0x1   :  { %10 = vsyncpa [#allocation6], 0 }
   0x2   :  { %11 = vsyncpa [#allocation4], 0 }
   0x3   :  { %12 = vsyncpa [#allocation9], 0  ;;  %s1200_s12 = smov [#allocation2]  }
   0x4   :  { %s18_s13 = sshll.u32 %s1200_s12, 4  ;;  %s19_s13 = int_to_ptr.vmem [resolvable:$true] %s18_s13 }
   0x5   :  { %s1120_s14 = scalar_lea.vmem %s19_s13, 768  ;;  %p1125_p1 = scmp.lt.s32.totalorder %s19_s13, %s19_s13 }
   0x6   :  { %p1121_p0 = scmp.ne.s32.totalorder %s19_s13, %s1120_s14  ;;  %p1126_p2 = scmp.lt.s32.totalorder %s1120_s14, %s1120_s14 }
   0x8   :  { %p1127_p3 = por %p1126_p2, %p1125_p1 }
   0xa   :  { %p1128_p4 = pnand %p1127_p3, %p1121_p0 }
   0xc   :  { %1131 = shalt.err (!%p1128_p4)
}
   0xd   :  { %s1201_s15 = smov 128   ;;  %s1202_s16 = smov 8  }
   0xe   :  { %24 = dma.hbm_to_vmem [thread:$0]  %s1368_s0, 768, %s19_s13, [#allocation3], %s1201_s15, %s1201_s15, %s1202_s16  }
   0xf   :  { %s1203_s19 = smov [#allocation5]  }
  0x10   :  { %s30_s20 = sshll.u32 %s1203_s19, 4  ;;  %s31_s20 = int_to_ptr.vmem [resolvable:$true] %s30_s20 }
  0x11   :  { %s1140_s21 = scalar_lea.vmem %s31_s20, 8192  ;;  %p1145_p6 = scmp.lt.s32.totalorder %s31_s20, %s31_s20 }
  0x12   :  { %p1141_p5 = scmp.ne.s32.totalorder %s31_s20, %s1140_s21  ;;  %p1146_p7 = scmp.lt.s32.totalorder %s1140_s21, %s1140_s21 }
  0x14   :  { %p1147_p8 = por %p1146_p7, %p1145_p6 }
  0x16   :  { %p1148_p9 = pnand %p1147_p8, %p1141_p5 }
  0x18   :  { %1151 = shalt.err (!%p1148_p9)
}
  0x19   :  { %s1204_s22 = smov 256   ;;  %s1205_s23 = smov 16  }
  0x1a   :  { %36 = dma.hbm_to_vmem [thread:$0]  %s1369_s1, 8192, %s31_s20, [#allocation6], %s1204_s22, %s1204_s22, %s1205_s23  }
  0x1b   :  { %1192 = dma.done.wait [#allocation3], 768  }
  0x1c   :  { %1193 = vsyncadd [#allocation3], 4294966528 }
  0x1d   :  { %1194 = dma.done.wait [#allocation6], 8192  }
  0x1e   :  { %1195 = vsyncadd [#allocation6], 4294959104  ;;  %v983_v0 = vld [vmem:[#allocation5 + $0xe4] ss:$16 sps:$4 sm:$0xff]   ;;  %v985_v1 = vld [vmem:[#allocation5 + $0xec] ss:$16 sps:$4 sm:$0xff]  }
  0x1f   :  { %463 = vmatprep.subr.bf16.mxu0 %v983_v0  ;;  %v987_v2 = vld [vmem:[#allocation5 + $0xe0] ss:$16 sps:$4 sm:$0xff]   ;;  %v988_v3 = vld [vmem:[#allocation5 + $0xe8] ss:$16 sps:$4 sm:$0xff]   ;;  %526 = vmatprep.subr.bf16.mxu1 %v985_v1  ;;  %v989_v4 = vld [vmem:[#allocation5 + $0xc4] ss:$16 sps:$4 sm:$0xff]  }
  0x20   :  { %464 = vmatpush1.bf16.msra.mxu0 %v987_v2  ;;  %527 = vmatpush1.bf16.msra.mxu1 %v988_v3  ;;  %v991_v5 = vld [vmem:[#allocation5 + $0xcc] ss:$16 sps:$4 sm:$0xff]   ;;  %v993_v6 = vld [vmem:[#allocation5 + $0xc0] ss:$16 sps:$4 sm:$0xff]   ;;  %v994_v7 = vld [vmem:[#allocation5 + $0xc8] ss:$16 sps:$4 sm:$0xff]  }
  0x21   :  { %465 = vmatprep.subr.bf16.mxu0 %v989_v4  ;;  %528 = vmatprep.subr.bf16.mxu1 %v991_v5  ;;  %v995_v8 = vld [vmem:[#allocation5 + $0xa4] ss:$16 sps:$4 sm:$0xff]   ;;  %v997_v9 = vld [vmem:[#allocation5 + $0xac] ss:$16 sps:$4 sm:$0xff]   ;;  %v999_v10 = vld [vmem:[#allocation5 + $0xa0] ss:$16 sps:$4 sm:$0xff]  }
  0x22   :  { %v1000_v11 = vld [vmem:[#allocation5 + $0xa8] ss:$16 sps:$4 sm:$0xff]   ;;  %v1001_v12 = vld [vmem:[#allocation5 + $0x84] ss:$16 sps:$4 sm:$0xff]   ;;  %v1003_v13 = vld [vmem:[#allocation5 + $0x8c] ss:$16 sps:$4 sm:$0xff]  }
  0x23   :  { %v1005_v14 = vld [vmem:[#allocation5 + $0x80] ss:$16 sps:$4 sm:$0xff]   ;;  %v1006_v15 = vld [vmem:[#allocation5 + $0x88] ss:$16 sps:$4 sm:$0xff]   ;;  %v1007_v16 = vld [vmem:[#allocation5 + $0x64] ss:$16 sps:$4 sm:$0xff]  }
  0x24   :  { %466 = vmatpush1.bf16.msra.mxu0 %v993_v6  ;;  %529 = vmatpush1.bf16.msra.mxu1 %v994_v7  ;;  %v1009_v17 = vld [vmem:[#allocation5 + $0x6c] ss:$16 sps:$4 sm:$0xff]   ;;  %v1011_v18 = vld [vmem:[#allocation5 + $0x60] ss:$16 sps:$4 sm:$0xff]   ;;  %v1012_v19 = vld [vmem:[#allocation5 + $0x68] ss:$16 sps:$4 sm:$0xff]  }
  0x25   :  { %467 = vmatprep.subr.bf16.mxu0 %v995_v8  ;;  %530 = vmatprep.subr.bf16.mxu1 %v997_v9  ;;  %v1013_v20 = vld [vmem:[#allocation5 + $0x44] ss:$16 sps:$4 sm:$0xff]   ;;  %v1015_v21 = vld [vmem:[#allocation5 + $0x4c] ss:$16 sps:$4 sm:$0xff]   ;;  %v1017_v22 = vld [vmem:[#allocation5 + $0x40] ss:$16 sps:$4 sm:$0xff]  }
  0x26   :  { %v1018_v23 = vld [vmem:[#allocation5 + $0x48] ss:$16 sps:$4 sm:$0xff]   ;;  %v1019_v24 = vld [vmem:[#allocation5 + $0x24] ss:$16 sps:$4 sm:$0xff]   ;;  %v1021_v25 = vld [vmem:[#allocation5 + $0x2c] ss:$16 sps:$4 sm:$0xff]  }
  0x27   :  { %v1023_v26 = vld [vmem:[#allocation5 + $0x20] ss:$16 sps:$4 sm:$0xff]   ;;  %v1024_v27 = vld [vmem:[#allocation5 + $0x28] ss:$16 sps:$4 sm:$0xff]   ;;  %v1025_v28 = vld [vmem:[#allocation5 + $0x4] ss:$16 sps:$4 sm:$0xff]  }
  0x28   :  { %468 = vmatpush1.bf16.msra.mxu0 %v999_v10  ;;  %531 = vmatpush1.bf16.msra.mxu1 %v1000_v11  ;;  %v1027_v29 = vld [vmem:[#allocation5 + $0xc] ss:$16 sps:$4 sm:$0xff]   ;;  %v1029_v30 = vld [vmem:[#allocation5] ss:$16 sps:$4 sm:$0xff]   ;;  %v1030_v31 = vld [vmem:[#allocation5 + $0x8] ss:$16 sps:$4 sm:$0xff]  }
  0x29   :  { %469 = vmatprep.subr.bf16.mxu0 %v1001_v12  ;;  %532 = vmatprep.subr.bf16.mxu1 %v1003_v13  ;;  %v1031_v32 = vld [vmem:[#allocation5 + $0x1e4] ss:$16 sps:$4 sm:$0xff]   ;;  %v1033_v33 = vld [vmem:[#allocation5 + $0x1ec] ss:$16 sps:$4 sm:$0xff]   ;;  %v1035_v34 = vld [vmem:[#allocation5 + $0x1e0] ss:$16 sps:$4 sm:$0xff]  }
  0x2a   :  { %v1036_v35 = vld [vmem:[#allocation5 + $0x1e8] ss:$16 sps:$4 sm:$0xff]   ;;  %v1037_v36 = vld [vmem:[#allocation5 + $0x1c4] ss:$16 sps:$4 sm:$0xff]   ;;  %v1039_v37 = vld [vmem:[#allocation5 + $0x1cc] ss:$16 sps:$4 sm:$0xff]  }
  0x2b   :  { %v1041_v38 = vld [vmem:[#allocation5 + $0x1c0] ss:$16 sps:$4 sm:$0xff]   ;;  %v1042_v39 = vld [vmem:[#allocation5 + $0x1c8] ss:$16 sps:$4 sm:$0xff]   ;;  %v1043_v40 = vld [vmem:[#allocation5 + $0x1a4] ss:$16 sps:$4 sm:$0xff]  }
  0x2c   :  { %470 = vmatpush1.bf16.msra.mxu0 %v1005_v14  ;;  %533 = vmatpush1.bf16.msra.mxu1 %v1006_v15  ;;  %v1045_v41 = vld [vmem:[#allocation5 + $0x1ac] ss:$16 sps:$4 sm:$0xff]   ;;  %v1047_v42 = vld [vmem:[#allocation5 + $0x1a0] ss:$16 sps:$4 sm:$0xff]   ;;  %v1048_v43 = vld [vmem:[#allocation5 + $0x1a8] ss:$16 sps:$4 sm:$0xff]  }
  0x2d   :  { %471 = vmatprep.subr.bf16.mxu0 %v1007_v16  ;;  %534 = vmatprep.subr.bf16.mxu1 %v1009_v17  ;;  %v1049_v44 = vld [vmem:[#allocation5 + $0x184] ss:$16 sps:$4 sm:$0xff]   ;;  %v1051_v45 = vld [vmem:[#allocation5 + $0x18c] ss:$16 sps:$4 sm:$0xff]   ;;  %v1053_v46 = vld [vmem:[#allocation5 + $0x180] ss:$16 sps:$4 sm:$0xff]  }
  0x2e   :  { %v1054_v47 = vld [vmem:[#allocation5 + $0x188] ss:$16 sps:$4 sm:$0xff]   ;;  %v1081_v48 = vld [vmem:[#allocation2 + $0x4] ss:$8 sps:$4 sm:$0xff]   ;;  %v1059_v51 = vld [vmem:[#allocation5 + $0x160] ss:$16 sps:$4 sm:$0xff]  }
  0x2f   :  { %v1055_v49 = vld [vmem:[#allocation5 + $0x164] ss:$16 sps:$4 sm:$0xff]   ;;  %v1057_v50 = vld [vmem:[#allocation5 + $0x16c] ss:$16 sps:$4 sm:$0xff]   ;;  %495 = vmatprep.mubr.bf16.mxu0 %v1081_v48  ;;  %558 = vmatprep.mubr.bf16.mxu1 %v1081_v48  ;;  %v1060_v52 = vld [vmem:[#allocation5 + $0x168] ss:$16 sps:$4 sm:$0xff]  }
  0x30   :  { %472 = vmatpush1.bf16.msra.mxu0 %v1011_v18  ;;  %535 = vmatpush1.bf16.msra.mxu1 %v1012_v19  ;;  %v1061_v53 = vld [vmem:[#allocation5 + $0x144] ss:$16 sps:$4 sm:$0xff]   ;;  %v1063_v54 = vld [vmem:[#allocation5 + $0x14c] ss:$16 sps:$4 sm:$0xff]   ;;  %v1065_v55 = vld [vmem:[#allocation5 + $0x140] ss:$16 sps:$4 sm:$0xff]  }
  0x31   :  { %473 = vmatprep.subr.bf16.mxu0 %v1013_v20  ;;  %536 = vmatprep.subr.bf16.mxu1 %v1015_v21  ;;  %v1066_v56 = vld [vmem:[#allocation5 + $0x148] ss:$16 sps:$4 sm:$0xff]   ;;  %v1067_v57 = vld [vmem:[#allocation5 + $0x124] ss:$16 sps:$4 sm:$0xff]   ;;  %v1069_v58 = vld [vmem:[#allocation5 + $0x12c] ss:$16 sps:$4 sm:$0xff]  }
  0x32   :  { %v1071_v59 = vld [vmem:[#allocation5 + $0x120] ss:$16 sps:$4 sm:$0xff]   ;;  %v1072_v60 = vld [vmem:[#allocation5 + $0x128] ss:$16 sps:$4 sm:$0xff]   ;;  %v1073_v61 = vld [vmem:[#allocation5 + $0x104] ss:$16 sps:$4 sm:$0xff]  }
  0x33   :  { %v1075_v62 = vld [vmem:[#allocation5 + $0x10c] ss:$16 sps:$4 sm:$0xff]   ;;  %v1077_v63 = vld [vmem:[#allocation5 + $0x100] ss:$16 sps:$4 sm:$0xff]   ;;  %v1078_v0 = vld [vmem:[#allocation5 + $0x108] ss:$16 sps:$4 sm:$0xff]  }
  0x34   :  { %474 = vmatpush1.bf16.msra.mxu0 %v1017_v22  ;;  %537 = vmatpush1.bf16.msra.mxu1 %v1018_v23  ;;  %v1079_v1 = vld [vmem:[#allocation2] ss:$8 sps:$4 sm:$0xff]   ;;  %v1082_v2 = vld [vmem:[#allocation2 + $0x14] ss:$8 sps:$4 sm:$0xff]   ;;  %v1084_v3 = vld [vmem:[#allocation2 + $0x10] ss:$8 sps:$4 sm:$0xff]  }
  0x35   :  { %475 = vmatprep.subr.bf16.mxu0 %v1019_v24  ;;  %538 = vmatprep.subr.bf16.mxu1 %v1021_v25  ;;  %v1085_v4 = vld [vmem:[#allocation2 + $0x24] ss:$8 sps:$4 sm:$0xff]   ;;  %v1087_v5 = vld [vmem:[#allocation2 + $0x20] ss:$8 sps:$4 sm:$0xff]   ;;  %s1206_s0 = smov [#allocation8]  }
  0x36   :  { %s852_s1 = sshll.u32 %s1206_s0, 4  ;;  %s853_s1 = int_to_ptr.vmem [resolvable:$true] %s852_s1 }
  0x37   :  { %s1152_s26 = scalar_lea.vmem %s853_s1, 1536  ;;  %p1157_p11 = scmp.lt.s32.totalorder %s853_s1, %s853_s1 }
  0x38   :  { %476 = vmatpush1.bf16.msra.mxu0 %v1023_v26  ;;  %539 = vmatpush1.bf16.msra.mxu1 %v1024_v27  ;;  %p1153_p10 = scmp.ne.s32.totalorder %s853_s1, %s1152_s26  ;;  %p1158_p12 = scmp.lt.s32.totalorder %s1152_s26, %s1152_s26 }
  0x39   :  { %477 = vmatprep.subr.bf16.mxu0 %v1025_v28  ;;  %540 = vmatprep.subr.bf16.mxu1 %v1027_v29 }
  0x3a   :  { %p1159_p13 = por %p1158_p12, %p1157_p11 }
  0x3c   :  { %478 = vmatpush1.bf16.msra.mxu0 %v1029_v30  ;;  %541 = vmatpush1.bf16.msra.mxu1 %v1030_v31  ;;  %p1160_p0 = pnand %p1159_p13, %p1153_p10 }
  0x3d   :  { %479 = vmatprep.subr.bf16.mxu0 %v1031_v32  ;;  %542 = vmatprep.subr.bf16.mxu1 %v1033_v33 }
  0x40   :  { %480 = vmatpush2.bf16.msra.mxu0 %v1035_v34  ;;  %543 = vmatpush2.bf16.msra.mxu1 %v1036_v35 }
  0x41   :  { %481 = vmatprep.subr.bf16.mxu0 %v1037_v36  ;;  %544 = vmatprep.subr.bf16.mxu1 %v1039_v37 }
  0x44   :  { %482 = vmatpush2.bf16.msra.mxu0 %v1041_v38  ;;  %545 = vmatpush2.bf16.msra.mxu1 %v1042_v39 }
  0x45   :  { %483 = vmatprep.subr.bf16.mxu0 %v1043_v40  ;;  %546 = vmatprep.subr.bf16.mxu1 %v1045_v41 }
  0x48   :  { %484 = vmatpush2.bf16.msra.mxu0 %v1047_v42  ;;  %547 = vmatpush2.bf16.msra.mxu1 %v1048_v43 }
  0x49   :  { %485 = vmatprep.subr.bf16.mxu0 %v1049_v44  ;;  %548 = vmatprep.subr.bf16.mxu1 %v1051_v45 }
  0x4c   :  { %486 = vmatpush2.bf16.msra.mxu0 %v1053_v46  ;;  %549 = vmatpush2.bf16.msra.mxu1 %v1054_v47 }
  0x4d   :  { %487 = vmatprep.subr.bf16.mxu0 %v1055_v49  ;;  %550 = vmatprep.subr.bf16.mxu1 %v1057_v50 }
  0x50   :  { %488 = vmatpush2.bf16.msra.mxu0 %v1059_v51  ;;  %551 = vmatpush2.bf16.msra.mxu1 %v1060_v52 }
  0x51   :  { %489 = vmatprep.subr.bf16.mxu0 %v1061_v53  ;;  %552 = vmatprep.subr.bf16.mxu1 %v1063_v54 }
  0x54   :  { %490 = vmatpush2.bf16.msra.mxu0 %v1065_v55  ;;  %553 = vmatpush2.bf16.msra.mxu1 %v1066_v56 }
  0x55   :  { %491 = vmatprep.subr.bf16.mxu0 %v1067_v57  ;;  %554 = vmatprep.subr.bf16.mxu1 %v1069_v58 }
  0x58   :  { %492 = vmatpush2.bf16.msra.mxu0 %v1071_v59  ;;  %555 = vmatpush2.bf16.msra.mxu1 %v1072_v60 }
  0x59   :  { %493 = vmatprep.subr.bf16.mxu0 %v1073_v61  ;;  %556 = vmatprep.subr.bf16.mxu1 %v1075_v62 }
  0x5c   :  { %494 = vmatpush2.bf16.msra.mxu0 %v1077_v63  ;;  %557 = vmatpush2.bf16.msra.mxu1 %v1078_v0 }
  0x5f   :  { %496 = vmatmul.mubr.bf16.vlgmr.msra.gmra.mxu0 %v1079_v1  ;;  %559 = vmatmul.mubr.bf16.vlgmr.msra.gmra.mxu1 %v1079_v1 }
  0x60   :  { %505 = vmatprep.mubr.bf16.mxu0 %v1082_v2  ;;  %568 = vmatprep.mubr.bf16.mxu1 %v1082_v2 }
  0x67   :  { %506 = vmatmul.mubr.bf16.gmra.mxu0 %v1084_v3  ;;  %569 = vmatmul.mubr.bf16.gmra.mxu1 %v1084_v3 }
  0x68   :  { %515 = vmatprep.mubr.bf16.mxu0 %v1085_v4  ;;  %578 = vmatprep.mubr.bf16.mxu1 %v1085_v4 }
  0x6f   :  { %516 = vmatmul.mubr.bf16.gmra.mxu0 %v1087_v5  ;;  %579 = vmatmul.mubr.bf16.gmra.mxu1 %v1087_v5 }
 0x11f   :  { %v497_v6 = vpop.f32.mrf.mxu0  ;;  %v560_v7 = vpop.f32.mrf.mxu1 }
 0x120   :  { %v589_v8 = vmul.f32 %v497_v6, %v497_v6  ;;  %v601_v9 = vmul.f32 %v560_v7, %v560_v7 }
 0x121   :  { %v499_v10 = vpop.f32.mrf.mxu0  ;;  %v562_v11 = vpop.f32.mrf.mxu1 }
 0x122   :  { %v1240_v12 = vadd.f32 %v601_v9, %v589_v8  ;;  %v590_v13 = vmul.f32 %v499_v10, %v499_v10  ;;  %v963_v14 = vpack.c.bf16 %v499_v10, %v497_v6  ;;  %v602_v15 = vmul.f32 %v562_v11, %v562_v11 }
 0x123   :  { %v964_v16 = vpack.c.bf16 %v562_v11, %v560_v7  ;;  %v501_v17 = vpop.f32.mrf.mxu0  ;;  %v564_v18 = vpop.f32.mrf.mxu1 }
 0x124   :  { %823 = vst [vmem:[#allocation8] sm:$0xff] %v963_v14  ;;  %v1242_v19 = vadd.f32 %v602_v15, %v590_v13  ;;  %1088 = vrsqrt.f32 %v1240_v12  ;;  %v591_v20 = vmul.f32 %v501_v17, %v501_v17  ;;  %v603_v21 = vmul.f32 %v564_v18, %v564_v18 }
 0x125   :  { %824 = vst [vmem:[#allocation8 + $0x8] sm:$0xff] %v964_v16  ;;  %v503_v22 = vpop.f32.mrf.mxu0  ;;  %v566_v23 = vpop.f32.mrf.mxu1  ;;  %vm627_vm0 = vcmp.eq.f32.partialorder %v1240_v12, inf  ;;  %v630_v61 = vand.u32 2147483648, %v1240_v12  ;;  %vm629_vm4 = vcmp.eq.f32.partialorder %v1240_v12, 0.0 }
 0x126   :  { %1090 = vrsqrt.f32 %v1242_v19  ;;  %v592_v24 = vmul.f32 %v503_v22, %v503_v22  ;;  %v1246_v25 = vadd.f32 %v603_v21, %v591_v20  ;;  %v965_v26 = vpack.c.bf16 %v503_v22, %v501_v17 }
 0x127   :  { %v604_v27 = vmul.f32 %v566_v23, %v566_v23  ;;  %v966_v28 = vpack.c.bf16 %v566_v23, %v564_v18  ;;  %v507_v29 = vpop.f32.mrf.mxu0  ;;  %v570_v30 = vpop.f32.mrf.mxu1  ;;  %vm634_vm1 = vcmp.eq.f32.partialorder %v1242_v19, inf  ;;  %v637_v2 = vand.u32 2147483648, %v1242_v19 }
 0x128   :  { %v593_v31 = vmul.f32 %v507_v29, %v507_v29  ;;  %v605_v32 = vmul.f32 %v570_v30, %v570_v30  ;;  %1092 = vrsqrt.f32 %v1246_v25  ;;  %825 = vst [vmem:[#allocation8 + $0x10] sm:$0xff] %v965_v26  ;;  %vm641_vm2 = vcmp.eq.f32.partialorder %v1246_v25, inf }
 0x129   :  { %v1249_v33 = vadd.f32 %v604_v27, %v592_v24  ;;  %826 = vst [vmem:[#allocation8 + $0x18] sm:$0xff] %v966_v28  ;;  %v509_v34 = vpop.f32.mrf.mxu0  ;;  %v572_v35 = vpop.f32.mrf.mxu1  ;;  %vm636_vm3 = vcmp.eq.f32.partialorder %v1242_v19, 0.0  ;;  %v644_v22 = vand.u32 2147483648, %v1246_v25 }
 0x12a   :  { %v1251_v36 = vadd.f32 %v605_v32, %v593_v31  ;;  %v594_v37 = vmul.f32 %v509_v34, %v509_v34  ;;  %v967_v38 = vpack.c.bf16 %v509_v34, %v507_v29  ;;  %v606_v39 = vmul.f32 %v572_v35, %v572_v35 }
 0x12b   :  { %1094 = vrsqrt.f32 %v1249_v33  ;;  %v968_v40 = vpack.c.bf16 %v572_v35, %v570_v30  ;;  %v511_v41 = vpop.f32.mrf.mxu0  ;;  %v574_v42 = vpop.f32.mrf.mxu1  ;;  %vm648_vm5 = vcmp.eq.f32.partialorder %v1249_v33, inf  ;;  %v651_v24 = vand.u32 2147483648, %v1249_v33 }
 0x12c   :  { %1096 = vrsqrt.f32 %v1251_v36  ;;  %827 = vst [vmem:[#allocation8 + $0x20] sm:$0xff] %v967_v38  ;;  %v1255_v43 = vadd.f32 %v606_v39, %v594_v37  ;;  %v595_v44 = vmul.f32 %v511_v41, %v511_v41  ;;  %v607_v45 = vmul.f32 %v574_v42, %v574_v42 }
 0x12d   :  { %828 = vst [vmem:[#allocation8 + $0x28] sm:$0xff] %v968_v40  ;;  %v513_v46 = vpop.f32.mrf.mxu0  ;;  %v576_v47 = vpop.f32.mrf.mxu1  ;;  %vm655_vm6 = vcmp.eq.f32.partialorder %v1251_v36, inf  ;;  %v658_v30 = vand.u32 2147483648, %v1251_v36 }
 0x12e   :  { %1098 = vrsqrt.f32 %v1255_v43  ;;  %v596_v48 = vmul.f32 %v513_v46, %v513_v46  ;;  %v1258_v49 = vadd.f32 %v607_v45, %v595_v44  ;;  %v969_v50 = vpack.c.bf16 %v513_v46, %v511_v41 }
 0x12f   :  { %v608_v51 = vmul.f32 %v576_v47, %v576_v47  ;;  %v970_v52 = vpack.c.bf16 %v576_v47, %v574_v42  ;;  %v517_v53 = vpop.f32.mrf.mxu0  ;;  %v580_v54 = vpop.f32.mrf.mxu1 }
 0x130   :  { %v597_v55 = vmul.f32 %v517_v53, %v517_v53  ;;  %v609_v56 = vmul.f32 %v580_v54, %v580_v54  ;;  %1100 = vrsqrt.f32 %v1258_v49  ;;  %829 = vst [vmem:[#allocation8 + $0x30] sm:$0xff] %v969_v50 }
 0x131   :  { %v1261_v57 = vadd.f32 %v608_v51, %v596_v48  ;;  %830 = vst [vmem:[#allocation8 + $0x38] sm:$0xff] %v970_v52  ;;  %v519_v58 = vpop.f32.mrf.mxu0  ;;  %v582_v59 = vpop.f32.mrf.mxu1 }
 0x132   :  { %v1089_v60 = vpop.eup %1088  ;;  %v1265_v62 = vadd.f32 %v609_v56, %v597_v55  ;;  %v598_v63 = vmul.f32 %v519_v58, %v519_v58  ;;  %v971_v0 = vpack.c.bf16 %v519_v58, %v517_v53  ;;  %v610_v3 = vmul.f32 %v582_v59, %v582_v59 }
 0x133   :  { %v1091_v1 = vpop.eup %1090  ;;  %1102 = vrsqrt.f32 %v1261_v57  ;;  %v521_v4 = vpop.f32.mrf.mxu0  ;;  %v972_v8 = vpack.c.bf16 %v582_v59, %v580_v54  ;;  %v626_v20 = vmul.f32 %v1089_v60, %v1240_v12 }
 0x134   :  { %v584_v5 = vpop.f32.mrf.mxu1  ;;  %v633_v6 = vmul.f32 %v1091_v1, %v1242_v19  ;;  %1104 = vrsqrt.f32 %v1265_v62  ;;  %831 = vst [vmem:[#allocation8 + $0x40] sm:$0xff] %v971_v0  ;;  %v1274_v7 = vadd.f32 %v610_v3, %v598_v63  ;;  %v599_v9 = vmul.f32 %v521_v4, %v521_v4 }
 0x135   :  { %v611_v10 = vmul.f32 %v584_v5, %v584_v5  ;;  %v523_v11 = vpop.f32.mrf.mxu0  ;;  %v1093_v14 = vpop.eup %1092  ;;  %832 = vst [vmem:[#allocation8 + $0x48] sm:$0xff] %v972_v8 }
 0x136   :  { %v586_v13 = vpop.f32.mrf.mxu1  ;;  %v600_v15 = vmul.f32 %v523_v11, %v523_v11  ;;  %v973_v16 = vpack.c.bf16 %v523_v11, %v521_v4  ;;  %v640_v21 = vmul.f32 %v1093_v14, %v1246_v25  ;;  %1106 = vrsqrt.f32 %v1274_v7 }
 0x137   :  { %v612_v17 = vmul.f32 %v586_v13, %v586_v13  ;;  %v974_v18 = vpack.c.bf16 %v586_v13, %v584_v5  ;;  %v1283_v26 = vadd.f32 %v611_v10, %v599_v9  ;;  %v635_v31 = vsel %vm634_vm1, %v1242_v19, %v633_v6 }
 0x138   :  { %v1095_v23 = vpop.eup %1094  ;;  %833 = vst [vmem:[#allocation8 + $0x50] sm:$0xff] %v973_v16 }
 0x139   :  { %v1285_v27 = vadd.f32 %v612_v17, %v600_v15  ;;  %834 = vst [vmem:[#allocation8 + $0x58] sm:$0xff] %v974_v18  ;;  %v1097_v28 = vpop.eup %1096  ;;  %v647_v29 = vmul.f32 %v1095_v23, %v1249_v33 }
 0x13a   :  { %1163 = shalt.err (!%p1160_p0)
}
 0x13b   :  { %858 = dma.vmem_to_hbm [thread:$0]  %s853_s1, 1536, %s1371_s3, [#allocation9], %s1204_s22, %s1204_s22, %s1205_s23   ;;  %v654_v32 = vmul.f32 %v1097_v28, %v1251_v36  ;;  %1108 = vrsqrt.f32 %v1283_v26  ;;  %vm643_vm7 = vcmp.eq.f32.partialorder %v1246_v25, 0.0  ;;  %vm650_vm8 = vcmp.eq.f32.partialorder %v1249_v33, 0.0  ;;  %v1099_v34 = vpop.eup %1098 }
 0x13c   :  { %vm662_vm9 = vcmp.eq.f32.partialorder %v1255_v43, inf  ;;  %1110 = vrsqrt.f32 %v1285_v27  ;;  %v628_v35 = vsel %vm627_vm0, %v1240_v12, %v626_v20  ;;  %v642_v37 = vsel %vm641_vm2, %v1246_v25, %v640_v21  ;;  %s1207_s3 = smov [#allocation7]  }
 0x13d   :  { %v661_v38 = vmul.f32 %v1099_v34, %v1255_v43  ;;  %v638_v39 = vsel %vm636_vm3, %v637_v2, %v635_v31  ;;  %v649_v40 = vsel %vm648_vm5, %v1249_v33, %v647_v29  ;;  %v656_v41 = vsel %vm655_vm6, %v1251_v36, %v654_v32  ;;  %v1101_v45 = vpop.eup %1100  ;;  %s840_s29 = sshll.u32 %s1207_s3, 4  ;;  %s841_s29 = int_to_ptr.vmem [resolvable:$true] %s840_s29 }
 0x13e   :  { %v665_v42 = vand.u32 2147483648, %v1255_v43  ;;  %v652_v44 = vsel %vm650_vm8, %v651_v24, %v649_v40  ;;  %vm657_vm10 = vcmp.eq.f32.partialorder %v1251_v36, 0.0  ;;  %vm664_vm11 = vcmp.eq.f32.partialorder %v1255_v43, 0.0  ;;  %s1172_s30 = scalar_lea.vmem %s841_s29, 768  ;;  %p1177_p2 = scmp.lt.s32.totalorder %s841_s29, %s841_s29 }
 0x13f   :  { %v631_v19 = vsel %vm629_vm4, %v630_v61, %v628_v35  ;;  %v645_v33 = vsel %vm643_vm7, %v644_v22, %v642_v37  ;;  %v659_v46 = vsel %vm657_vm10, %v658_v30, %v656_v41  ;;  %v663_v47 = vsel %vm662_vm9, %v1255_v43, %v661_v38  ;;  %p1173_p1 = scmp.ne.s32.totalorder %s841_s29, %s1172_s30  ;;  %p1178_p3 = scmp.lt.s32.totalorder %s1172_s30, %s1172_s30 }
 0x140   :  { %v668_v48 = vmul.f32 %v1101_v45, %v1258_v49  ;;  %v666_v50 = vsel %vm664_vm11, %v665_v42, %v663_v47  ;;  %v957_v36 = vpack.c.bf16 %v638_v39, %v631_v19  ;;  %v958_v51 = vpack.c.bf16 %v652_v44, %v645_v33  ;;  %v1103_v52 = vpop.eup %1102 }
 0x141   :  { %vm669_vm12 = vcmp.eq.f32.partialorder %v1258_v49, inf  ;;  %v959_v53 = vpack.c.bf16 %v666_v50, %v659_v46  ;;  %v1105_v54 = vpop.eup %1104  ;;  %v675_v12 = vmul.f32 %v1103_v52, %v1261_v57  ;;  %v672_v55 = vand.u32 2147483648, %v1258_v49  ;;  %p1179_p4 = por %p1178_p3, %p1177_p2 }
 0x142   :  { %v670_v25 = vsel %vm669_vm12, %v1258_v49, %v668_v48  ;;  %745 = vst [vmem:[#allocation7] sm:$0xff] %v957_v36  ;;  %746 = vst [vmem:[#allocation7 + $0x8] sm:$0xff] %v958_v51  ;;  %vm676_vm13 = vcmp.eq.f32.partialorder %v1261_v57, inf  ;;  %v679_v43 = vand.u32 2147483648, %v1261_v57  ;;  %v682_v56 = vmul.f32 %v1105_v54, %v1265_v62 }
 0x143   :  { %747 = vst [vmem:[#allocation7 + $0x10] sm:$0xff] %v959_v53  ;;  %vm671_vm14 = vcmp.eq.f32.partialorder %v1258_v49, 0.0  ;;  %v677_v58 = vsel %vm676_vm13, %v1261_v57, %v675_v12  ;;  %vm678_vm15 = vcmp.eq.f32.partialorder %v1261_v57, 0.0  ;;  %v1107_v59 = vpop.eup %1106  ;;  %vm683_vm0 = vcmp.eq.f32.partialorder %v1265_v62, inf  ;;  %p1180_p5 = pnand %p1179_p4, %p1173_p1 }
 0x144   :  { %v673_v60 = vsel %vm671_vm14, %v672_v55, %v670_v25  ;;  %v680_v61 = vsel %vm678_vm15, %v679_v43, %v677_v58  ;;  %v689_v63 = vmul.f32 %v1107_v59, %v1274_v7  ;;  %v684_v0 = vsel %vm683_vm0, %v1265_v62, %v682_v56 }
 0x145   :  { %v960_v1 = vpack.c.bf16 %v680_v61, %v673_v60  ;;  %v686_v2 = vand.u32 2147483648, %v1265_v62  ;;  %vm690_vm1 = vcmp.eq.f32.partialorder %v1274_v7, inf  ;;  %v693_v49 = vand.u32 2147483648, %v1274_v7 }
 0x146   :  { %vm685_vm2 = vcmp.eq.f32.partialorder %v1265_v62, 0.0  ;;  %v691_v57 = vsel %vm690_vm1, %v1274_v7, %v689_v63  ;;  %vm692_vm3 = vcmp.eq.f32.partialorder %v1274_v7, 0.0  ;;  %vm697_vm4 = vcmp.eq.f32.partialorder %v1283_v26, inf }
 0x147   :  { %748 = vst [vmem:[#allocation7 + $0x18] sm:$0xff] %v960_v1  ;;  %v687_v6 = vsel %vm685_vm2, %v686_v2, %v684_v0  ;;  %v694_v8 = vsel %vm692_vm3, %v693_v49, %v691_v57  ;;  %v700_v11 = vand.u32 2147483648, %v1283_v26  ;;  %vm704_vm5 = vcmp.eq.f32.partialorder %v1285_v27, inf }
 0x148   :  { %v1109_v3 = vpop.eup %1108  ;;  %v961_v10 = vpack.c.bf16 %v694_v8, %v687_v6  ;;  %v707_v62 = vand.u32 2147483648, %v1285_v27  ;;  %vm706_vm6 = vcmp.eq.f32.partialorder %v1285_v27, 0.0  ;;  %vm699_vm7 = vcmp.eq.f32.partialorder %v1283_v26, 0.0 }
 0x149   :  { %v1111_v4 = vpop.eup %1110  ;;  %v696_v5 = vmul.f32 %v1109_v3, %v1283_v26 }
 0x14a   :  { %v703_v9 = vmul.f32 %v1111_v4, %v1285_v27  ;;  %749 = vst [vmem:[#allocation7 + $0x20] sm:$0xff] %v961_v10 }
 0x14b   :  { %v698_v13 = vsel %vm697_vm4, %v1283_v26, %v696_v5 }
 0x14c   :  { %v705_v7 = vsel %vm704_vm5, %v1285_v27, %v703_v9  ;;  %v701_v14 = vsel %vm699_vm7, %v700_v11, %v698_v13 }
 0x14d   :  { %v708_v15 = vsel %vm706_vm6, %v707_v62, %v705_v7 }
 0x14e   :  { %v962_v16 = vpack.c.bf16 %v708_v15, %v701_v14 }
 0x150   :  { %750 = vst [vmem:[#allocation7 + $0x28] sm:$0xff] %v962_v16 }
 0x151   :  { %1183 = shalt.err (!%p1180_p5)
}
 0x152   :  { %846 = dma.vmem_to_hbm [thread:$0]  %s841_s29, 768, %s1370_s2, [#allocation4], %s1201_s15, %s1201_s15, %s1202_s16  }
 0x153   :  { %1196 = dma.done.wait [#allocation4], 768  }
 0x154   :  { %1197 = vsyncadd [#allocation4], 4294966528 }
 0x155   :  { %1198 = dma.done.wait [#allocation9], 1536  }
 0x156   :  { %1199 = vsyncadd [#allocation9], 4294965760 }
 0x157   :  { %865 = vsyncpa [#allocation3], 1 }
 0x158   :  { %866 = vsyncpa [#allocation6], 1 }
 0x159   :  { %867 = vsyncpa [#allocation4], 1 }
 0x15a   :  { %868 = vsyncpa [#allocation9], 1 }

</bundles_post_ra>
